<compile_context>
chip_gen: v7x
topology: tpu7x:2x2x1
jax: 0.10.0
libtpu: 0.0.40
codegen_flags: <defaults>
</compile_context>

<pallas_src>
import functools

import jax
import jax.numpy as jnp
from jax.experimental import pallas as pl
from jax.experimental.pallas import tpu as pltpu

EPS = 1e-5
_LANES = 128                      # TPU vreg lane width
_MAX_TILE_ROWS = 1024             # rows per grid step (multiple of 8)
_VMEM_BUDGET_PER_BUF = 4 * 1024 * 1024


def _round_up(n: int, m: int) -> int:
    return ((n + m - 1) // m) * m


def _standardize_kernel(x_ref, o_ref, *, seg_w: int):
    """Standardize independent length-`seg_w` segments packed along lanes.

    x_ref / o_ref: (TR, L) tile.  Either L == seg_w (one segment per row,
    generic path) or L == 128 with L // seg_w segments per lane-row
    (lane-dense packed path; seg_w divides 128).
    """
    x = x_ref[...].astype(jnp.float32)
    tr, L = x.shape
    inv_w = jnp.float32(1.0 / seg_w)

    if seg_w == L:
        # Generic path: one segment per row, reduce over the full last axis.
        mean = jnp.sum(x, axis=-1, keepdims=True) * inv_w
        centered = x - mean
        var = jnp.sum(centered * centered, axis=-1, keepdims=True) * inv_w
    else:
        # Lane-dense packed path: L == 128, aligned segments of width seg_w.
        lane = jax.lax.broadcasted_iota(jnp.int32, (tr, L), 1)
        seg_start = (lane % seg_w) == 0

        def seg_sum(v):
            # 1) windowed sum: lane l accumulates lanes l .. l+seg_w-1
            #    (roll by -s == roll by L - s; XLU rolls, VPU adds).
            z = v
            s = 1
            while s < seg_w:
                z = z + pltpu.roll(z, L - s, 1)
                s *= 2
            # 2) keep only the complete per-segment sums (segment-start lanes)
            z = jnp.where(seg_start, z, 0.0)
            # 3) broadcast each segment's sum across its seg_w lanes.
            s = 1
            while s < seg_w:
                z = z + pltpu.roll(z, s, 1)
                s *= 2
            return z

        mean = seg_sum(x) * inv_w
        centered = x - mean
        var = seg_sum(centered * centered) * inv_w

    std = jnp.sqrt(var)
    inv = pl.reciprocal(std + EPS, approx=False)  # exact -> matches reference
    o_ref[...] = (centered * inv).astype(o_ref.dtype)


def my_transform(x):
    """Pallas implementation of MyTransform(transform_fn)(x) for the chosen
    transform_fn (per-last-axis standardization).  x: (B, C, H, W)."""
    B, C, H, W = x.shape
    R = B * C * H
    out_dtype = x.dtype

    # Lane-dense packing: put 128 // W rows into each 128-lane row when W is a
    # small divisor of 128 (free reshape of a contiguous buffer).
    if W < _LANES and _LANES % W == 0:
        pack = _LANES // W
        L = _LANES
    else:
        pack = 1
        L = W

    x2d = x.reshape(R, W)
    r_grp = _round_up(R, pack)
    if r_grp != R:                          # padded rows are discarded below
        x2d = jnp.pad(x2d, ((0, r_grp - R), (0, 0)))
    rows = r_grp // pack
    xp = x2d.reshape(rows, L)

    # Row tile: biggest multiple of 8 under the per-buffer VMEM budget so the
    # double-buffered in/out tiles + f32 temporaries stay small on every gen.
    tr_cap = max(8, _VMEM_BUDGET_PER_BUF // (L * 4))
    tr = min(_MAX_TILE_ROWS, tr_cap, _round_up(rows, 8))
    tr = max(8, (tr // 8) * 8)

    rows_pad = _round_up(rows, tr)
    if rows_pad != rows:                    # padded rows -> harmless zeros
        xp = jnp.pad(xp, ((0, rows_pad - rows), (0, 0)))

    kernel = functools.partial(_standardize_kernel, seg_w=W)

    out = pl.pallas_call(
        kernel,
        out_shape=jax.ShapeDtypeStruct((rows_pad, L), out_dtype),
        grid=(rows_pad // tr,),
        in_specs=[pl.BlockSpec((tr, L), lambda i: (i, 0))],
        out_specs=pl.BlockSpec((tr, L), lambda i: (i, 0)),
        compiler_params=pltpu.CompilerParams(
            dimension_semantics=("parallel",),      # independent row tiles
            vmem_limit_bytes=32 * 1024 * 1024,
        ),
    )(xp)

    out = out[:rows].reshape(r_grp, W)[:R].reshape(B, C, H, W)
    return out


def _reference(x):
    xf = x.astype(jnp.float32)
    mean = jnp.mean(xf, axis=-1, keepdims=True)
    centered = xf - mean
    std = jnp.sqrt(jnp.mean(centered * centered, axis=-1, keepdims=True))
    return (centered / (std + EPS)).astype(x.dtype)


def _check(x):
    y = my_transform(x)
    jax.block_until_ready(y)
    y_ref = _reference(x)
    assert y.shape == x.shape and y.dtype == x.dtype
    err = jnp.max(jnp.abs(y.astype(jnp.float32) - y_ref.astype(jnp.float32)))
    assert jnp.allclose(y, y_ref, atol=1e-5, rtol=1e-5), float(err)


if __name__ == "__main__":
    keys = jax.random.split(jax.random.PRNGKey(0), 3)

    # Primary shape from the module spec (lane-dense packed path, W=16).
    _check(jax.random.normal(keys[0], (2, 4, 16, 16), dtype=jnp.float32))
    # Generic path (W does not divide 128) + row padding.
    _check(jax.random.normal(keys[1], (3, 5, 7, 20), dtype=jnp.float32))
    # Larger packed case exercising a multi-step (pipelined, parallel) grid.
    _check(jax.random.normal(keys[2], (2, 8, 1024, 16), dtype=jnp.float32))

    print("KERNEL_OK")
</pallas_src>

<mosaic_0001>
module attributes {stable_mosaic.version = 11 : i64} {
  func.func @_standardize_kernel(%arg0: i32, %arg1: memref<16x128xf32, #tpu.memory_space<vmem>>, %arg2: memref<16x128xf32, #tpu.memory_space<vmem>>) attributes {dimension_semantics = [#tpu.dimension_semantics<parallel>], iteration_bounds = array<i64: 1>, scalar_prefetch = 0 : i64, scratch_operands = 0 : i64, tpu.core_type = #tpu.core_type<tc>, window_params = [{transform_indices = @transform_0, window_bounds = array<i64: 16, 128>}, {transform_indices = @transform_1, window_bounds = array<i64: 16, 128>}]} {
    %c0 = arith.constant 0 : index
    %c0_0 = arith.constant 0 : index
    %0 = vector.load %arg1[%c0, %c0_0] : memref<16x128xf32, #tpu.memory_space<vmem>>, vector<16x128xf32>
    %1 = tpu.iota {dimensions = array<i32: 1>} : vector<16x128xi32>
    %c16_i32 = arith.constant 16 : i32
    %c0_i32 = arith.constant 0 : i32
    %2 = arith.cmpi eq, %c16_i32, %c0_i32 : i32
    %c1_i32 = arith.constant 1 : i32
    %3 = arith.select %2, %c1_i32, %c16_i32 : i32
    %4 = vector.broadcast %3 : i32 to vector<16x128xi32>
    %5 = arith.remsi %1, %4 : vector<16x128xi32>
    %c0_i32_1 = arith.constant 0 : i32
    %6 = vector.broadcast %c0_i32_1 : i32 to vector<16x128xi32>
    %7 = arith.cmpi ne, %5, %6 : vector<16x128xi32>
    %c0_i32_2 = arith.constant 0 : i32
    %8 = vector.broadcast %c0_i32_2 : i32 to vector<16x128xi32>
    %9 = arith.cmpi slt, %5, %8 : vector<16x128xi32>
    %c0_i32_3 = arith.constant 0 : i32
    %10 = arith.cmpi slt, %3, %c0_i32_3 : i32
    %11 = vector.broadcast %10 : i1 to vector<16x128xi1>
    %12 = vector.broadcast %11 : vector<16x128xi1> to vector<16x128xi1>
    %13 = arith.xori %9, %12 : vector<16x128xi1>
    %14 = arith.andi %13, %7 : vector<16x128xi1>
    %15 = vector.broadcast %3 : i32 to vector<16x128xi32>
    %16 = arith.addi %5, %15 : vector<16x128xi32>
    %17 = arith.select %14, %16, %5 : vector<16x128xi1>, vector<16x128xi32>
    %c0_i32_4 = arith.constant 0 : i32
    %18 = vector.broadcast %c0_i32_4 : i32 to vector<16x128xi32>
    %19 = arith.cmpi eq, %17, %18 : vector<16x128xi32>
    %c127_i32 = arith.constant 127 : i32
    %20 = tpu.dynamic_rotate %0 by %c127_i32 dim 1 : vector<16x128xf32>, i32 -> vector<16x128xf32>
    %21 = arith.addf %0, %20 : vector<16x128xf32>
    %c126_i32 = arith.constant 126 : i32
    %22 = tpu.dynamic_rotate %21 by %c126_i32 dim 1 : vector<16x128xf32>, i32 -> vector<16x128xf32>
    %23 = arith.addf %21, %22 : vector<16x128xf32>
    %c124_i32 = arith.constant 124 : i32
    %24 = tpu.dynamic_rotate %23 by %c124_i32 dim 1 : vector<16x128xf32>, i32 -> vector<16x128xf32>
    %25 = arith.addf %23, %24 : vector<16x128xf32>
    %c120_i32 = arith.constant 120 : i32
    %26 = tpu.dynamic_rotate %25 by %c120_i32 dim 1 : vector<16x128xf32>, i32 -> vector<16x128xf32>
    %27 = arith.addf %25, %26 : vector<16x128xf32>
    %cst = arith.constant 0.000000e+00 : f32
    %28 = vector.broadcast %cst : f32 to vector<16x128xf32>
    %29 = arith.select %19, %27, %28 : vector<16x128xi1>, vector<16x128xf32>
    %c1_i32_5 = arith.constant 1 : i32
    %30 = tpu.dynamic_rotate %29 by %c1_i32_5 dim 1 : vector<16x128xf32>, i32 -> vector<16x128xf32>
    %31 = arith.addf %29, %30 : vector<16x128xf32>
    %c2_i32 = arith.constant 2 : i32
    %32 = tpu.dynamic_rotate %31 by %c2_i32 dim 1 : vector<16x128xf32>, i32 -> vector<16x128xf32>
    %33 = arith.addf %31, %32 : vector<16x128xf32>
    %c4_i32 = arith.constant 4 : i32
    %34 = tpu.dynamic_rotate %33 by %c4_i32 dim 1 : vector<16x128xf32>, i32 -> vector<16x128xf32>
    %35 = arith.addf %33, %34 : vector<16x128xf32>
    %c8_i32 = arith.constant 8 : i32
    %36 = tpu.dynamic_rotate %35 by %c8_i32 dim 1 : vector<16x128xf32>, i32 -> vector<16x128xf32>
    %37 = arith.addf %35, %36 : vector<16x128xf32>
    %cst_6 = arith.constant 6.250000e-02 : f32
    %38 = vector.broadcast %cst_6 : f32 to vector<16x128xf32>
    %39 = arith.mulf %37, %38 : vector<16x128xf32>
    %40 = arith.subf %0, %39 : vector<16x128xf32>
    %41 = arith.mulf %40, %40 : vector<16x128xf32>
    %c127_i32_7 = arith.constant 127 : i32
    %42 = tpu.dynamic_rotate %41 by %c127_i32_7 dim 1 : vector<16x128xf32>, i32 -> vector<16x128xf32>
    %43 = arith.addf %41, %42 : vector<16x128xf32>
    %c126_i32_8 = arith.constant 126 : i32
    %44 = tpu.dynamic_rotate %43 by %c126_i32_8 dim 1 : vector<16x128xf32>, i32 -> vector<16x128xf32>
    %45 = arith.addf %43, %44 : vector<16x128xf32>
    %c124_i32_9 = arith.constant 124 : i32
    %46 = tpu.dynamic_rotate %45 by %c124_i32_9 dim 1 : vector<16x128xf32>, i32 -> vector<16x128xf32>
    %47 = arith.addf %45, %46 : vector<16x128xf32>
    %c120_i32_10 = arith.constant 120 : i32
    %48 = tpu.dynamic_rotate %47 by %c120_i32_10 dim 1 : vector<16x128xf32>, i32 -> vector<16x128xf32>
    %49 = arith.addf %47, %48 : vector<16x128xf32>
    %cst_11 = arith.constant 0.000000e+00 : f32
    %50 = vector.broadcast %cst_11 : f32 to vector<16x128xf32>
    %51 = arith.select %19, %49, %50 : vector<16x128xi1>, vector<16x128xf32>
    %c1_i32_12 = arith.constant 1 : i32
    %52 = tpu.dynamic_rotate %51 by %c1_i32_12 dim 1 : vector<16x128xf32>, i32 -> vector<16x128xf32>
    %53 = arith.addf %51, %52 : vector<16x128xf32>
    %c2_i32_13 = arith.constant 2 : i32
    %54 = tpu.dynamic_rotate %53 by %c2_i32_13 dim 1 : vector<16x128xf32>, i32 -> vector<16x128xf32>
    %55 = arith.addf %53, %54 : vector<16x128xf32>
    %c4_i32_14 = arith.constant 4 : i32
    %56 = tpu.dynamic_rotate %55 by %c4_i32_14 dim 1 : vector<16x128xf32>, i32 -> vector<16x128xf32>
    %57 = arith.addf %55, %56 : vector<16x128xf32>
    %c8_i32_15 = arith.constant 8 : i32
    %58 = tpu.dynamic_rotate %57 by %c8_i32_15 dim 1 : vector<16x128xf32>, i32 -> vector<16x128xf32>
    %59 = arith.addf %57, %58 : vector<16x128xf32>
    %cst_16 = arith.constant 6.250000e-02 : f32
    %60 = vector.broadcast %cst_16 : f32 to vector<16x128xf32>
    %61 = arith.mulf %59, %60 : vector<16x128xf32>
    %62 = math.sqrt %61 : vector<16x128xf32>
    %cst_17 = arith.constant 9.99999974E-6 : f32
    %63 = vector.broadcast %cst_17 : f32 to vector<16x128xf32>
    %64 = arith.addf %62, %63 : vector<16x128xf32>
    %65 = tpu.reciprocal %64 : vector<16x128xf32> -> vector<16x128xf32>
    %66 = arith.mulf %40, %65 : vector<16x128xf32>
    %c0_18 = arith.constant 0 : index
    %c0_19 = arith.constant 0 : index
    %67 = vector.load %arg2[%c0_18, %c0_19] : memref<16x128xf32, #tpu.memory_space<vmem>>, vector<16x128xf32>
    tpu.vector_store %arg2[%c0_18, %c0_19], %66 {strides = array<i32>} : memref<16x128xf32, #tpu.memory_space<vmem>>, vector<16x128xf32>,
    return
  }
  func.func @transform_0(%arg0: i32) -> (i32, i32) {
    %c0_i32 = arith.constant 0 : i32
    %c0_i32_0 = arith.constant 0 : i32
    return %arg0, %c0_i32 : i32, i32
  }
  func.func @transform_1(%arg0: i32) -> (i32, i32) {
    %c0_i32 = arith.constant 0 : i32
    %c0_i32_0 = arith.constant 0 : i32
    return %arg0, %c0_i32 : i32, i32
  }
}

</mosaic_0001>

<bundles_post_ra>
// kernel: tpu_custom_call.1
= control target key start
LH: loop header
LB: loop body
LE: loop exit
PB: predicated region body
PF: predicated region fallthrough
CT: control target
= control target key end

     0   :  { %6 = vsyncpa [#allocation3], 0  ;;  %s369_s0 = inlined_call_operand.hbm [shape: f32[16,128], index: 0, kind: input, shape index: {}]   ;;  %s370_s1 = inlined_call_operand.hbm [shape: f32[16,128], index: 1, kind: output, shape index: {}]  }
   0x1   :  { %7 = vsyncpa [#allocation4], 0  ;;  %s254_s6 = smov [#allocation2]   ;;  %s206_s10 = scalar_lea.hbm %s369_s0, 256 }
   0x2   :  { %s13_s7 = sshll.u32 %s254_s6, 4  ;;  %p207_p0 = scmp.ne.s32.totalorder %s369_s0, %s206_s10  ;;  %s14_s7 = int_to_ptr.vmem [resolvable:$true] %s13_s7 }
   0x3   :  { %p210_p1 = scmp.lt.u32.totalorder %s206_s10, %s369_s0 }
   0x5   :  { %p212_p2 = pnand %p210_p1, %p207_p0 }
   0x7   :  { %215 = shalt.err (!%p212_p2)
}
   0x8   :  { %s216_s15 = scalar_lea.vmem %s14_s7, 256  ;;  %p221_p4 = scmp.lt.s32.totalorder %s14_s7, %s14_s7 }
   0x9   :  { %p217_p3 = scmp.ne.s32.totalorder %s14_s7, %s216_s15  ;;  %p222_p5 = scmp.lt.s32.totalorder %s216_s15, %s216_s15 }
   0xb   :  { %p223_p6 = por %p222_p5, %p221_p4 }
   0xd   :  { %p224_p7 = pnand %p223_p6, %p217_p3 }
   0xf   :  { %227 = shalt.err (!%p224_p7)
}
  0x10   :  { %s255_s16 = smov 128   ;;  %s256_s17 = smov 8  }
  0x11   :  { %19 = dma.hbm_to_vmem [thread:$0]  %s369_s0, 256, %s14_s7, [#allocation3], %s255_s16, %s255_s16, %s256_s17  }
  0x12   :  { %250 = dma.done.wait [#allocation3], 256  }
  0x13   :  { %251 = vsyncadd [#allocation3], 4294967040  ;;  %v290_v0 = vld [vmem:[#allocation2] sm:$0xff]  ;;  %s257_s20 = smov 127   ;;  %v294_v1 = vld [vmem:[#allocation2 + $0x8] sm:$0xff]  ;;  %s258_s21 = smov 126   ;;  %v25_v14 = vlaneseq }
  0x14   :  { %40 = vrot.lane.b32.xlu0 %v290_v0, %s257_s20  ;;  %s259_s0 = smov 124   ;;  %s260_s22 = smov 120  }
  0x15   :  { %v26_v15 = vand.u32 127, %v25_v14  ;;  %s261_s23 = smov 1   ;;  %s262_s24 = smov 2  }
  0x16   :  { %s263_s25 = smov 4   ;;  %s264_s26 = smov [#allocation5]  }
  0x17   :  { %v31_v16 = vand.u32 15, %v26_v15  ;;  %s175_s27 = sshll.u32 %s264_s26, 4  ;;  %s176_s27 = int_to_ptr.vmem [resolvable:$true] %s175_s27 }
  0x18   :  { %42 = vrot.lane.b32.xlu0 %v294_v1, %s257_s20  ;;  %s228_s28 = scalar_lea.vmem %s176_s27, 256  ;;  %p233_p9 = scmp.lt.s32.totalorder %s176_s27, %s176_s27 }
  0x19   :  { %vm306_vm0 = vcmp.eq.s32.totalorder %v31_v16, 0  ;;  %p229_p8 = scmp.ne.s32.totalorder %s176_s27, %s228_s28  ;;  %p234_p10 = scmp.lt.s32.totalorder %s228_s28, %s228_s28 }
  0x1b   :  { %p235_p11 = por %p234_p10, %p233_p9 }
  0x1d   :  { %p236_p12 = pnand %p235_p11, %p229_p8 }
  0x86   :  { %v41_v2 = vpop.permute.xlu0 %40 }
  0x87   :  { %v44_v3 = vadd.f32 %v41_v2, %v290_v0 }
  0x89   :  { %46 = vrot.lane.b32.xlu1 %v44_v3, %s258_s21 }
  0x8a   :  { %v43_v4 = vpop.permute.xlu0 %42 }
  0x8b   :  { %v45_v5 = vadd.f32 %v43_v4, %v294_v1 }
  0x8d   :  { %48 = vrot.lane.b32.xlu1 %v45_v5, %s258_s21 }
  0xfb   :  { %v47_v6 = vpop.permute.xlu1 %46 }
  0xfc   :  { %v50_v7 = vadd.f32 %v47_v6, %v44_v3 }
  0xfe   :  { %52 = vrot.lane.b32.xlu0 %v50_v7, %s259_s0 }
  0xff   :  { %v49_v8 = vpop.permute.xlu1 %48 }
 0x100   :  { %v51_v9 = vadd.f32 %v49_v8, %v45_v5 }
 0x102   :  { %54 = vrot.lane.b32.xlu1 %v51_v9, %s259_s0 }
 0x170   :  { %v53_v10 = vpop.permute.xlu0 %52 }
 0x171   :  { %v56_v11 = vadd.f32 %v53_v10, %v50_v7 }
 0x173   :  { %58 = vrot.lane.b32.xlu0 %v56_v11, %s260_s22 }
 0x174   :  { %v55_v12 = vpop.permute.xlu1 %54 }
 0x175   :  { %v57_v13 = vadd.f32 %v55_v12, %v51_v9 }
 0x177   :  { %60 = vrot.lane.b32.xlu1 %v57_v13, %s260_s22 }
 0x1e5   :  { %v59_v17 = vpop.permute.xlu0 %58 }
 0x1e6   :  { %v62_v19 = vadd.f32 %v59_v17, %v56_v11 }
 0x1e8   :  { %v64_v20 = vsel %vm306_vm0, %v62_v19, 0.0 }
 0x1e9   :  { %v61_v21 = vpop.permute.xlu1 %60  ;;  %66 = vrot.lane.b32.xlu0 %v64_v20, %s261_s23 }
 0x1ea   :  { %v63_v22 = vadd.f32 %v61_v21, %v57_v13 }
 0x1ec   :  { %v65_v23 = vsel %vm306_vm0, %v63_v22, 0.0 }
 0x1ed   :  { %68 = vrot.lane.b32.xlu1 %v65_v23, %s261_s23 }
 0x25b   :  { %v67_v24 = vpop.permute.xlu0 %66 }
 0x25c   :  { %v70_v25 = vadd.f32 %v67_v24, %v64_v20 }
 0x25e   :  { %72 = vrot.lane.b32.xlu0 %v70_v25, %s262_s24 }
 0x25f   :  { %v69_v26 = vpop.permute.xlu1 %68 }
 0x260   :  { %v71_v27 = vadd.f32 %v69_v26, %v65_v23 }
 0x262   :  { %74 = vrot.lane.b32.xlu1 %v71_v27, %s262_s24 }
 0x2d0   :  { %v73_v28 = vpop.permute.xlu0 %72 }
 0x2d1   :  { %v76_v29 = vadd.f32 %v73_v28, %v70_v25 }
 0x2d3   :  { %78 = vrot.lane.b32.xlu0 %v76_v29, %s263_s25 }
 0x2d4   :  { %v75_v30 = vpop.permute.xlu1 %74 }
 0x2d5   :  { %v77_v31 = vadd.f32 %v75_v30, %v71_v27 }
 0x2d7   :  { %80 = vrot.lane.b32.xlu1 %v77_v31, %s263_s25 }
 0x345   :  { %v79_v32 = vpop.permute.xlu0 %78 }
 0x346   :  { %v82_v33 = vadd.f32 %v79_v32, %v76_v29 }
 0x348   :  { %84 = vrot.lane.b32.xlu0 %v82_v33, %s256_s17 }
 0x349   :  { %v81_v34 = vpop.permute.xlu1 %80 }
 0x34a   :  { %v83_v35 = vadd.f32 %v81_v34, %v77_v31 }
 0x34c   :  { %86 = vrot.lane.b32.xlu1 %v83_v35, %s256_s17 }
 0x3ba   :  { %v85_v36 = vpop.permute.xlu0 %84 }
 0x3bb   :  { %v88_v37 = vadd.f32 %v85_v36, %v82_v33 }
 0x3bd   :  { %v90_v38 = vmul.f32 0.0625, %v88_v37 }
 0x3be   :  { %v87_v39 = vpop.permute.xlu1 %86 }
 0x3bf   :  { %v323_v40 = vsub.f32 %v290_v0, %v90_v38  ;;  %v89_v41 = vadd.f32 %v87_v39, %v83_v35 }
 0x3c1   :  { %v91_v42 = vmul.f32 0.0625, %v89_v41  ;;  %v94_v43 = vmul.f32 %v323_v40, %v323_v40 }
 0x3c3   :  { %v328_v44 = vsub.f32 %v294_v1, %v91_v42  ;;  %96 = vrot.lane.b32.xlu0 %v94_v43, %s257_s20 }
 0x3c5   :  { %v95_v45 = vmul.f32 %v328_v44, %v328_v44 }
 0x3c7   :  { %98 = vrot.lane.b32.xlu1 %v95_v45, %s257_s20 }
 0x435   :  { %v97_v46 = vpop.permute.xlu0 %96 }
 0x436   :  { %v100_v47 = vadd.f32 %v97_v46, %v94_v43 }
 0x438   :  { %102 = vrot.lane.b32.xlu0 %v100_v47, %s258_s21 }
 0x439   :  { %v99_v48 = vpop.permute.xlu1 %98 }
 0x43a   :  { %v101_v49 = vadd.f32 %v99_v48, %v95_v45 }
 0x43c   :  { %104 = vrot.lane.b32.xlu1 %v101_v49, %s258_s21 }
 0x4aa   :  { %v103_v50 = vpop.permute.xlu0 %102 }
 0x4ab   :  { %v106_v51 = vadd.f32 %v103_v50, %v100_v47 }
 0x4ad   :  { %108 = vrot.lane.b32.xlu0 %v106_v51, %s259_s0 }
 0x4ae   :  { %v105_v52 = vpop.permute.xlu1 %104 }
 0x4af   :  { %v107_v53 = vadd.f32 %v105_v52, %v101_v49 }
 0x4b1   :  { %110 = vrot.lane.b32.xlu1 %v107_v53, %s259_s0 }
 0x51f   :  { %v109_v54 = vpop.permute.xlu0 %108 }
 0x520   :  { %v112_v55 = vadd.f32 %v109_v54, %v106_v51 }
 0x522   :  { %114 = vrot.lane.b32.xlu0 %v112_v55, %s260_s22 }
 0x523   :  { %v111_v56 = vpop.permute.xlu1 %110 }
 0x524   :  { %v113_v57 = vadd.f32 %v111_v56, %v107_v53 }
 0x526   :  { %116 = vrot.lane.b32.xlu1 %v113_v57, %s260_s22 }
 0x594   :  { %v115_v58 = vpop.permute.xlu0 %114 }
 0x595   :  { %v118_v59 = vadd.f32 %v115_v58, %v112_v55 }
 0x597   :  { %v120_v60 = vsel %vm306_vm0, %v118_v59, 0.0 }
 0x598   :  { %v117_v61 = vpop.permute.xlu1 %116  ;;  %122 = vrot.lane.b32.xlu0 %v120_v60, %s261_s23 }
 0x599   :  { %v119_v62 = vadd.f32 %v117_v61, %v113_v57 }
 0x59b   :  { %v121_v63 = vsel %vm306_vm0, %v119_v62, 0.0 }
 0x59c   :  { %124 = vrot.lane.b32.xlu1 %v121_v63, %s261_s23 }
 0x60a   :  { %v123_v0 = vpop.permute.xlu0 %122 }
 0x60b   :  { %v126_v1 = vadd.f32 %v123_v0, %v120_v60 }
 0x60d   :  { %128 = vrot.lane.b32.xlu0 %v126_v1, %s262_s24 }
 0x60e   :  { %v125_v2 = vpop.permute.xlu1 %124 }
 0x60f   :  { %v127_v3 = vadd.f32 %v125_v2, %v121_v63 }
 0x611   :  { %130 = vrot.lane.b32.xlu1 %v127_v3, %s262_s24 }
 0x67f   :  { %v129_v4 = vpop.permute.xlu0 %128 }
 0x680   :  { %v132_v5 = vadd.f32 %v129_v4, %v126_v1 }
 0x682   :  { %134 = vrot.lane.b32.xlu0 %v132_v5, %s263_s25 }
 0x683   :  { %v131_v6 = vpop.permute.xlu1 %130 }
 0x684   :  { %v133_v7 = vadd.f32 %v131_v6, %v127_v3 }
 0x686   :  { %136 = vrot.lane.b32.xlu1 %v133_v7, %s263_s25 }
 0x6f4   :  { %v135_v8 = vpop.permute.xlu0 %134 }
 0x6f5   :  { %v138_v9 = vadd.f32 %v135_v8, %v132_v5 }
 0x6f7   :  { %140 = vrot.lane.b32.xlu0 %v138_v9, %s256_s17 }
 0x6f8   :  { %v137_v10 = vpop.permute.xlu1 %136 }
 0x6f9   :  { %v139_v11 = vadd.f32 %v137_v10, %v133_v7 }
 0x6fb   :  { %142 = vrot.lane.b32.xlu1 %v139_v11, %s256_s17 }
 0x769   :  { %v141_v12 = vpop.permute.xlu0 %140 }
 0x76a   :  { %v144_v13 = vadd.f32 %v141_v12, %v138_v9 }
 0x76c   :  { %v146_v14 = vmul.f32 0.0625, %v144_v13 }
 0x76d   :  { %v143_v15 = vpop.permute.xlu1 %142 }
 0x76e   :  { %198 = vrsqrt.f32 %v146_v14  ;;  %v145_v16 = vadd.f32 %v143_v15, %v139_v11  ;;  %vm150_vm1 = vcmp.eq.f32.partialorder %v146_v14, inf  ;;  %v153_v20 = vand.u32 2147483648, %v146_v14 }
 0x76f   :  { %vm152_vm2 = vcmp.eq.f32.partialorder %v146_v14, 0.0 }
 0x770   :  { %v147_v17 = vmul.f32 0.0625, %v145_v16 }
 0x772   :  { %200 = vrsqrt.f32 %v147_v17  ;;  %vm157_vm3 = vcmp.eq.f32.partialorder %v147_v17, inf  ;;  %v160_v26 = vand.u32 2147483648, %v147_v17  ;;  %vm159_vm4 = vcmp.eq.f32.partialorder %v147_v17, 0.0 }
 0x778   :  { %v199_v18 = vpop.eup %198 }
 0x779   :  { %v149_v19 = vmul.f32 %v199_v18, %v146_v14 }
 0x77b   :  { %v151_v21 = vsel %vm150_vm1, %v146_v14, %v149_v19 }
 0x77c   :  { %v154_v22 = vsel %vm152_vm2, %v153_v20, %v151_v21  ;;  %v201_v23 = vpop.eup %200 }
 0x77d   :  { %v162_v24 = vadd.f32 1e-05, %v154_v22  ;;  %v156_v25 = vmul.f32 %v201_v23, %v147_v17 }
 0x77f   :  { %202 = vrcp.f32 %v162_v24  ;;  %v158_v27 = vsel %vm157_vm3, %v147_v17, %v156_v25 }
 0x780   :  { %v161_v28 = vsel %vm159_vm4, %v160_v26, %v158_v27 }
 0x781   :  { %v163_v29 = vadd.f32 1e-05, %v161_v28 }
 0x783   :  { %204 = vrcp.f32 %v163_v29 }
 0x789   :  { %v203_v30 = vpop.eup %202 }
 0x78a   :  { %v166_v31 = vmul.f32 %v203_v30, %v323_v40 }
 0x78c   :  { %168 = vst [vmem:[#allocation5] sm:$0xff] %v166_v31 }
 0x78d   :  { %v205_v32 = vpop.eup %204 }
 0x78e   :  { %v167_v33 = vmul.f32 %v205_v32, %v328_v44 }
 0x790   :  { %169 = vst [vmem:[#allocation5 + $0x8] sm:$0xff] %v167_v33 }
 0x791   :  { %239 = shalt.err (!%p236_p12)
}
 0x792   :  { %s240_s2 = scalar_lea.hbm %s370_s1, 256 }
 0x793   :  { %p241_p13 = scmp.ne.s32.totalorder %s370_s1, %s240_s2  ;;  %p244_p0 = scmp.lt.u32.totalorder %s240_s2, %s370_s1 }
 0x795   :  { %p246_p1 = pnand %p244_p0, %p241_p13 }
 0x797   :  { %249 = shalt.err (!%p246_p1)
}
 0x798   :  { %181 = dma.vmem_to_hbm [thread:$0]  %s176_s27, 256, %s370_s1, [#allocation4], %s255_s16, %s255_s16, %s256_s17  }
 0x799   :  { %252 = dma.done.wait [#allocation4], 256  }
 0x79a   :  { %253 = vsyncadd [#allocation4], 4294967040 }
 0x79b   :  { %185 = vsyncpa [#allocation3], 1 }
 0x79c   :  { %186 = vsyncpa [#allocation4], 1 }

</bundles_post_ra>
